<compile_context>
chip_gen: v6e
topology: v6e:2x2x1
jax: 0.10.0
libtpu: 0.0.40
codegen_flags: <defaults>
</compile_context>

<pallas_src>
import math

import jax
import jax.numpy as jnp
from jax.experimental import pallas as pl
from jax.experimental.pallas import tpu as pltpu


# ---------------------------------------------------------------------------
# Kernels
# ---------------------------------------------------------------------------
def _noisy_linear_train_kernel(x_ref, xs_ref, wmu_ref, wsig_ref, eout_ref,
                               b_ref, o_ref, accm_ref, accs_ref):
    """One (TM, TN) output tile, accumulated over the K grid axis.

    y = x @ Wmu_T + ((x * eps_in) @ Wsig_T) * eps_out + (bias_mu + bias_sigma*bias_eps)
    The (out, in) weight_epsilon matrix is never materialized.
    """
    k = pl.program_id(2)

    @pl.when(k == 0)
    def _init():
        accm_ref[...] = jnp.zeros_like(accm_ref)
        accs_ref[...] = jnp.zeros_like(accs_ref)

    accm_ref[...] += jnp.dot(x_ref[...], wmu_ref[...],
                             preferred_element_type=jnp.float32)
    accs_ref[...] += jnp.dot(xs_ref[...], wsig_ref[...],
                             preferred_element_type=jnp.float32)

    @pl.when(k == pl.num_programs(2) - 1)
    def _finalize():
        # eout_ref / b_ref are (1, TN) f32 rows indexed only by the N axis.
        y = accm_ref[...] + accs_ref[...] * eout_ref[...] + b_ref[...]
        o_ref[...] = y.astype(o_ref.dtype)


def _noisy_linear_eval_kernel(x_ref, wmu_ref, b_ref, o_ref, acc_ref):
    """Eval path: y = x @ weight_mu.T + bias_mu (no sigma / epsilon traffic)."""
    k = pl.program_id(2)

    @pl.when(k == 0)
    def _init():
        acc_ref[...] = jnp.zeros_like(acc_ref)

    acc_ref[...] += jnp.dot(x_ref[...], wmu_ref[...],
                            preferred_element_type=jnp.float32)

    @pl.when(k == pl.num_programs(2) - 1)
    def _finalize():
        o_ref[...] = (acc_ref[...] + b_ref[...]).astype(o_ref.dtype)


# ---------------------------------------------------------------------------
# Tiling helpers
# ---------------------------------------------------------------------------
def _cdiv(a, b):
    return -(-a // b)


def _round_up(a, m):
    return _cdiv(a, m) * m


def _tile_and_pad(dim, cap, granule, min_blocks=1):
    """Pick (tile, padded_dim): tile is a multiple of `granule`, roughly <= cap,
    padded_dim a multiple of tile.  Minimizes the number of grid steps (pads up)
    instead of collapsing the tile to `granule` for awkward dims."""
    dim_g = _round_up(max(dim, 1), granule)
    cap_g = max(_round_up(min(cap, dim_g), granule), granule)
    nblocks = max(min_blocks, _cdiv(dim_g, cap_g))
    tile = _round_up(_cdiv(dim_g, nblocks), granule)
    padded = _round_up(dim_g, tile)
    return tile, padded


def _split_for_megacore(dim_p, tile):
    """If this (parallel) axis has a single block, split it into >=2 exact
    128-multiple blocks (no extra padding) so both v7x TensorCores get work."""
    if dim_p // tile > 1:
        return tile
    t = (dim_p // 2) // 128 * 128
    while t >= 128:
        if dim_p % t == 0:
            return t
        t -= 128
    return tile


def _pad2d(a, rows, cols):
    pr, pc = rows - a.shape[0], cols - a.shape[1]
    if pr == 0 and pc == 0:
        return a
    return jnp.pad(a, ((0, pr), (0, pc)))


# ---------------------------------------------------------------------------
# One-time parameter preparation (amortized across forward calls)
# ---------------------------------------------------------------------------
def prepare_noisy_linear(params, *, dtype=jnp.float32, tile_n=512, tile_k=1024,
                         split_n_for_megacore=True):
    """Pre-transpose / pre-pad / cast the parameters once.

    params: dict with weight_mu/weight_sigma (out, in), bias_mu/bias_sigma (out,),
            eps_in (in,), eps_out (out,), optional bias_epsilon (out,).
    Returns a plan dict consumed by noisy_linear_forward.
    """
    wmu = params["weight_mu"]
    wsig = params["weight_sigma"]
    out_f, in_f = wmu.shape

    tk, in_p = _tile_and_pad(in_f, tile_k, 128)
    tn, out_p = _tile_and_pad(out_f, tile_n, 128)
    if split_n_for_megacore:
        tn = _split_for_megacore(out_p, tn)

    def row_f32(v):
        return _pad2d(v.reshape(1, -1).astype(jnp.float32), 1, out_p)

    bias_eps = params.get("bias_epsilon", params["eps_out"])

    return dict(
        dtype=dtype, in_features=in_f, out_features=out_f,
        in_pad=in_p, out_pad=out_p, tk=tk, tn=tn,
        # (in_p, out_p) MXU-native, lane-dense, compute-dtype weights.
        wmu_t=_pad2d(wmu.T.astype(dtype), in_p, out_p),
        wsig_t=_pad2d(wsig.T.astype(dtype), in_p, out_p),
        bias_mu=row_f32(params["bias_mu"]),
        bias_sigma=row_f32(params["bias_sigma"]),
        bias_epsilon=row_f32(bias_eps),
        eps_out=row_f32(params["eps_out"]),
        eps_in=jnp.pad(params["eps_in"].astype(dtype),
                       (0, in_p - in_f)).reshape(1, in_p),
    )


# ---------------------------------------------------------------------------
# Forward
# ---------------------------------------------------------------------------
def noisy_linear_forward(x, prepared, *, training=True, tile_m=512):
    """Pallas NoisyLinear forward.  x: (B, in_features)."""
    p = prepared
    dtype = p["dtype"]
    B, in_f = x.shape
    assert in_f == p["in_features"], "input feature size mismatch"

    in_p, out_p, tk, tn = p["in_pad"], p["out_pad"], p["tk"], p["tn"]
    out_f = p["out_features"]

    # Whole padded batch is one M tile when it fits (<= tile_m): every extra
    # M tile re-streams both full weight matrices from HBM.
    tm, B_p = _tile_and_pad(B, tile_m, 8)

    x_c = x.astype(dtype)
    if (B_p, in_p) != (B, in_f):
        x_c = jnp.pad(x_c, ((0, B_p - B), (0, in_p - in_f)))

    grid = (B_p // tm, out_p // tn, in_p // tk)

    x_spec = pl.BlockSpec((tm, tk), lambda m, n, k: (m, k))
    w_spec = pl.BlockSpec((tk, tn), lambda m, n, k: (k, n))
    row_spec = pl.BlockSpec((1, tn), lambda m, n, k: (0, n))
    out_spec = pl.BlockSpec((tm, tn), lambda m, n, k: (m, n))
    out_shape = jax.ShapeDtypeStruct((B_p, out_p), dtype)

    compiler_params = pltpu.CompilerParams(
        dimension_semantics=("parallel", "parallel", "arbitrary"),
        vmem_limit_bytes=48 * 1024 * 1024,  # fits v7x's 64 MiB physical VMEM
    )

    if training:
        # Factored noise: xs = x * eps_in (padded eps_in entries are zero, so
        # the padded K columns contribute nothing).
        xs = x_c * p["eps_in"]
        # Combined bias = bias_mu + bias_sigma * bias_epsilon (one (1,out) row,
        # no separate bias_epsilon stream into the kernel).
        bias = p["bias_mu"] + p["bias_sigma"] * p["bias_epsilon"]

        y = pl.pallas_call(
            _noisy_linear_train_kernel,
            out_shape=out_shape,
            grid=grid,
            in_specs=[x_spec, x_spec, w_spec, w_spec, row_spec, row_spec],
            out_specs=out_spec,
            scratch_shapes=[pltpu.VMEM((tm, tn), jnp.float32),
                            pltpu.VMEM((tm, tn), jnp.float32)],
            compiler_params=compiler_params,
        )(x_c, xs, p["wmu_t"], p["wsig_t"], p["eps_out"], bias)
    else:
        y = pl.pallas_call(
            _noisy_linear_eval_kernel,
            out_shape=out_shape,
            grid=grid,
            in_specs=[x_spec, w_spec, row_spec],
            out_specs=out_spec,
            scratch_shapes=[pltpu.VMEM((tm, tn), jnp.float32)],
            compiler_params=compiler_params,
        )(x_c, p["wmu_t"], p["bias_mu"])

    if (B_p, out_p) != (B, out_f):
        y = y[:B, :out_f]
    return y


# ---------------------------------------------------------------------------
# Deterministic parameter / noise init (mirrors reset_parameters/reset_noise;
# the weight noise stays factored as eps_in/eps_out so the (out,in)
# weight_epsilon matrix is never materialized).
# ---------------------------------------------------------------------------
def init_noisy_linear(key, in_features, out_features, std_init=0.4):
    k_wmu, k_bmu, k_ein, k_eout = jax.random.split(key, 4)
    mu_range = 1.0 / math.sqrt(in_features)

    weight_mu = jax.random.uniform(
        k_wmu, (out_features, in_features), jnp.float32, -mu_range, mu_range)
    weight_sigma = jnp.full((out_features, in_features),
                            std_init / math.sqrt(in_features), jnp.float32)
    bias_mu = jax.random.uniform(
        k_bmu, (out_features,), jnp.float32, -mu_range, mu_range)
    bias_sigma = jnp.full((out_features,),
                          std_init / math.sqrt(out_features), jnp.float32)

    def scale_noise(k, size):
        v = jax.random.normal(k, (size,), jnp.float32)
        return jnp.sign(v) * jnp.sqrt(jnp.abs(v))

    eps_in = scale_noise(k_ein, in_features)
    eps_out = scale_noise(k_eout, out_features)

    return dict(weight_mu=weight_mu, weight_sigma=weight_sigma,
                eps_in=eps_in, eps_out=eps_out,
                bias_mu=bias_mu, bias_sigma=bias_sigma,
                bias_epsilon=eps_out)           # reset_noise(): bias_eps = eps_out


def noisy_linear_reference(x, p, *, training=True):
    if training:
        weight_epsilon = jnp.outer(p["eps_out"], p["eps_in"])
        w = p["weight_mu"] + p["weight_sigma"] * weight_epsilon
        b = p["bias_mu"] + p["bias_sigma"] * p["bias_epsilon"]
    else:
        w, b = p["weight_mu"], p["bias_mu"]
    return x @ w.T + b


if __name__ == "__main__":
    key = jax.random.PRNGKey(0)

    # (batch, in_f, out_f, dtype, tile_k, tile_n, atol, rtol)
    #  - small padded shapes, ragged shapes, a forced multi-K/multi-N grid
    #    (tile caps of 128) to exercise the accumulator path, and a bf16 case
    #    exercising the low-precision streaming path (looser tolerance).
    cases = [
        (8, 32, 32, jnp.float32, 1024, 512, 5e-5, 1e-5),
        (8, 768, 256, jnp.float32, 1024, 512, 5e-5, 1e-5),
        (5, 40, 24, jnp.float32, 1024, 512, 5e-5, 1e-5),
        (8, 768, 256, jnp.float32, 128, 128, 5e-5, 1e-5),
        (8, 768, 256, jnp.bfloat16, 1024, 512, 5e-2, 5e-2),
    ]

    for batch, in_f, out_f, dtype, tk_cap, tn_cap, atol, rtol in cases:
        k_param, k_x, key = jax.random.split(key, 3)
        raw = init_noisy_linear(k_param, in_f, out_f, std_init=0.4)
        prep = prepare_noisy_linear(raw, dtype=dtype,
                                    tile_k=tk_cap, tile_n=tn_cap)
        x = jax.random.normal(k_x, (batch, in_f), jnp.float32)

        for training in (True, False):
            out = jax.block_until_ready(
                noisy_linear_forward(x.astype(dtype), prep, training=training))
            ref = noisy_linear_reference(x, raw, training=training)
            assert out.shape == (batch, out_f)
            assert jnp.allclose(out.astype(jnp.float32), ref,
                                atol=atol, rtol=rtol), (
                f"mismatch vs reference at {(batch, in_f, out_f)}, "
                f"dtype={dtype}, training={training}")

    print("KERNEL_OK")
</pallas_src>

<mosaic_0001>
module attributes {stable_mosaic.version = 11 : i64} {
  func.func @_noisy_linear_train_kernel(%arg0: i32, %arg1: i32, %arg2: i32, %arg3: memref<8x128xf32, #tpu.memory_space<vmem>>, %arg4: memref<8x128xf32, #tpu.memory_space<vmem>>, %arg5: memref<128x128xf32, #tpu.memory_space<vmem>>, %arg6: memref<128x128xf32, #tpu.memory_space<vmem>>, %arg7: memref<1x128xf32, #tpu.memory_space<vmem>>, %arg8: memref<1x128xf32, #tpu.memory_space<vmem>>, %arg9: memref<8x128xf32, #tpu.memory_space<vmem>>, %arg10: memref<8x128xf32, #tpu.memory_space<vmem>>, %arg11: memref<8x128xf32, #tpu.memory_space<vmem>>) attributes {dimension_semantics = [#tpu.dimension_semantics<parallel>, #tpu.dimension_semantics<parallel>, #tpu.dimension_semantics<arbitrary>], iteration_bounds = array<i64: 1, 1, 1>, scalar_prefetch = 0 : i64, scratch_operands = 2 : i64, tpu.core_type = #tpu.core_type<tc>, window_params = [{transform_indices = @transform_0, window_bounds = array<i64: 8, 128>}, {transform_indices = @transform_1, window_bounds = array<i64: 8, 128>}, {transform_indices = @transform_2, window_bounds = array<i64: 128, 128>}, {transform_indices = @transform_3, window_bounds = array<i64: 128, 128>}, {transform_indices = @transform_4, window_bounds = array<i64: 1, 128>}, {transform_indices = @transform_5, window_bounds = array<i64: 1, 128>}, {transform_indices = @transform_6, window_bounds = array<i64: 8, 128>}]} {
    %c0_i32 = arith.constant 0 : i32
    %0 = arith.cmpi eq, %arg2, %c0_i32 : i32
    %1 = arith.extui %0 : i1 to i32
    %c0_i32_0 = arith.constant 0 : i32
    %2 = arith.cmpi ne, %1, %c0_i32_0 : i32
    scf.if %2 {
      %cst_19 = arith.constant 0.000000e+00 : f32
      %18 = vector.broadcast %cst_19 : f32 to vector<8x128xf32>
      %c0_20 = arith.constant 0 : index
      %c0_21 = arith.constant 0 : index
      %19 = vector.load %arg10[%c0_20, %c0_21] : memref<8x128xf32, #tpu.memory_space<vmem>>, vector<8x128xf32>
      tpu.vector_store %arg10[%c0_20, %c0_21], %18 {strides = array<i32>} : memref<8x128xf32, #tpu.memory_space<vmem>>, vector<8x128xf32>,
      %cst_22 = arith.constant 0.000000e+00 : f32
      %20 = vector.broadcast %cst_22 : f32 to vector<8x128xf32>
      %c0_23 = arith.constant 0 : index
      %c0_24 = arith.constant 0 : index
      %21 = vector.load %arg11[%c0_23, %c0_24] : memref<8x128xf32, #tpu.memory_space<vmem>>, vector<8x128xf32>
      tpu.vector_store %arg11[%c0_23, %c0_24], %20 {strides = array<i32>} : memref<8x128xf32, #tpu.memory_space<vmem>>, vector<8x128xf32>,
    } else {
    }
    %c0 = arith.constant 0 : index
    %c0_1 = arith.constant 0 : index
    %3 = vector.load %arg10[%c0, %c0_1] : memref<8x128xf32, #tpu.memory_space<vmem>>, vector<8x128xf32>
    %c0_2 = arith.constant 0 : index
    %c0_3 = arith.constant 0 : index
    %4 = vector.load %arg3[%c0_2, %c0_3] : memref<8x128xf32, #tpu.memory_space<vmem>>, vector<8x128xf32>
    %c0_4 = arith.constant 0 : index
    %c0_5 = arith.constant 0 : index
    %5 = vector.load %arg5[%c0_4, %c0_5] : memref<128x128xf32, #tpu.memory_space<vmem>>, vector<128x128xf32>
    %cst = arith.constant dense<0.000000e+00> : vector<8x128xf32>
    %6 = tpu.matmul %4, %5, %cst {dimension_numbers = #tpu.dot_dimension_numbers<[1], [0], [0], [1], [0, 0, 1, 1], [], []>} : vector<8x128xf32>, vector<128x128xf32>, vector<8x128xf32> -> vector<8x128xf32>
    %7 = arith.addf %3, %6 : vector<8x128xf32>
    %c0_6 = arith.constant 0 : index
    %c0_7 = arith.constant 0 : index
    %8 = vector.load %arg10[%c0_6, %c0_7] : memref<8x128xf32, #tpu.memory_space<vmem>>, vector<8x128xf32>
    tpu.vector_store %arg10[%c0_6, %c0_7], %7 {strides = array<i32>} : memref<8x128xf32, #tpu.memory_space<vmem>>, vector<8x128xf32>,
    %c0_8 = arith.constant 0 : index
    %c0_9 = arith.constant 0 : index
    %9 = vector.load %arg11[%c0_8, %c0_9] : memref<8x128xf32, #tpu.memory_space<vmem>>, vector<8x128xf32>
    %c0_10 = arith.constant 0 : index
    %c0_11 = arith.constant 0 : index
    %10 = vector.load %arg4[%c0_10, %c0_11] : memref<8x128xf32, #tpu.memory_space<vmem>>, vector<8x128xf32>
    %c0_12 = arith.constant 0 : index
    %c0_13 = arith.constant 0 : index
    %11 = vector.load %arg6[%c0_12, %c0_13] : memref<128x128xf32, #tpu.memory_space<vmem>>, vector<128x128xf32>
    %cst_14 = arith.constant dense<0.000000e+00> : vector<8x128xf32>
    %12 = tpu.matmul %10, %11, %cst_14 {dimension_numbers = #tpu.dot_dimension_numbers<[1], [0], [0], [1], [0, 0, 1, 1], [], []>} : vector<8x128xf32>, vector<128x128xf32>, vector<8x128xf32> -> vector<8x128xf32>
    %13 = arith.addf %9, %12 : vector<8x128xf32>
    %c0_15 = arith.constant 0 : index
    %c0_16 = arith.constant 0 : index
    %14 = vector.load %arg11[%c0_15, %c0_16] : memref<8x128xf32, #tpu.memory_space<vmem>>, vector<8x128xf32>
    tpu.vector_store %arg11[%c0_15, %c0_16], %13 {strides = array<i32>} : memref<8x128xf32, #tpu.memory_space<vmem>>, vector<8x128xf32>,
    %c0_i32_17 = arith.constant 0 : i32
    %15 = arith.cmpi eq, %arg2, %c0_i32_17 : i32
    %16 = arith.extui %15 : i1 to i32
    %c0_i32_18 = arith.constant 0 : i32
    %17 = arith.cmpi ne, %16, %c0_i32_18 : i32
    scf.if %17 {
      %c0_19 = arith.constant 0 : index
      %c0_20 = arith.constant 0 : index
      %18 = vector.load %arg10[%c0_19, %c0_20] : memref<8x128xf32, #tpu.memory_space<vmem>>, vector<8x128xf32>
      %c0_21 = arith.constant 0 : index
      %c0_22 = arith.constant 0 : index
      %19 = vector.load %arg11[%c0_21, %c0_22] : memref<8x128xf32, #tpu.memory_space<vmem>>, vector<8x128xf32>
      %c0_23 = arith.constant 0 : index
      %c0_24 = arith.constant 0 : index
      %20 = vector.load %arg7[%c0_23, %c0_24] : memref<1x128xf32, #tpu.memory_space<vmem>>, vector<1x128xf32>
      %21 = vector.broadcast %20 : vector<1x128xf32> to vector<8x128xf32>
      %22 = arith.mulf %19, %21 : vector<8x128xf32>
      %23 = arith.addf %18, %22 : vector<8x128xf32>
      %c0_25 = arith.constant 0 : index
      %c0_26 = arith.constant 0 : index
      %24 = vector.load %arg8[%c0_25, %c0_26] : memref<1x128xf32, #tpu.memory_space<vmem>>, vector<1x128xf32>
      %25 = vector.broadcast %24 : vector<1x128xf32> to vector<8x128xf32>
      %26 = arith.addf %23, %25 : vector<8x128xf32>
      %c0_27 = arith.constant 0 : index
      %c0_28 = arith.constant 0 : index
      %27 = vector.load %arg9[%c0_27, %c0_28] : memref<8x128xf32, #tpu.memory_space<vmem>>, vector<8x128xf32>
      tpu.vector_store %arg9[%c0_27, %c0_28], %26 {strides = array<i32>} : memref<8x128xf32, #tpu.memory_space<vmem>>, vector<8x128xf32>,
    } else {
    }
    return
  }
  func.func @transform_0(%arg0: i32, %arg1: i32, %arg2: i32) -> (i32, i32) {
    %c0_i32 = arith.constant 0 : i32
    return %arg0, %arg2 : i32, i32
  }
  func.func @transform_1(%arg0: i32, %arg1: i32, %arg2: i32) -> (i32, i32) {
    %c0_i32 = arith.constant 0 : i32
    return %arg0, %arg2 : i32, i32
  }
  func.func @transform_2(%arg0: i32, %arg1: i32, %arg2: i32) -> (i32, i32) {
    %c0_i32 = arith.constant 0 : i32
    return %arg2, %arg1 : i32, i32
  }
  func.func @transform_3(%arg0: i32, %arg1: i32, %arg2: i32) -> (i32, i32) {
    %c0_i32 = arith.constant 0 : i32
    return %arg2, %arg1 : i32, i32
  }
  func.func @transform_4(%arg0: i32, %arg1: i32, %arg2: i32) -> (i32, i32) {
    %c0_i32 = arith.constant 0 : i32
    %c0_i32_0 = arith.constant 0 : i32
    return %c0_i32, %arg1 : i32, i32
  }
  func.func @transform_5(%arg0: i32, %arg1: i32, %arg2: i32) -> (i32, i32) {
    %c0_i32 = arith.constant 0 : i32
    %c0_i32_0 = arith.constant 0 : i32
    return %c0_i32, %arg1 : i32, i32
  }
  func.func @transform_6(%arg0: i32, %arg1: i32, %arg2: i32) -> (i32, i32) {
    %c0_i32 = arith.constant 0 : i32
    return %arg0, %arg1 : i32, i32
  }
}

</mosaic_0001>

<bundles_post_ra>
// kernel: tpu_custom_call.1
= control target key start
LH: loop header
LB: loop body
LE: loop exit
PB: predicated region body
PF: predicated region fallthrough
CT: control target
= control target key end

     0   :  { %11 = vsyncpa [#allocation5], 0  ;;  %s623_s0 = inlined_call_operand.hbm [shape: f32[8,128], index: 0, kind: input, shape index: {}]   ;;  %s624_s1 = inlined_call_operand.hbm [shape: f32[8,128], index: 1, kind: input, shape index: {}]   ;;  %s625_s2 = inlined_call_operand.hbm [shape: f32[128,128], index: 2, kind: input, shape index: {}]   ;;  %s626_s3 = inlined_call_operand.hbm [shape: f32[128,128], index: 3, kind: input, shape index: {}]   ;;  %s627_s4 = inlined_call_operand.vmem [shape: f32[1,128], index: 4, kind: input, shape index: {}]   ;;  %s628_s5 = inlined_call_operand.vmem [shape: f32[1,128], index: 5, kind: input, shape index: {}]   ;;  %s629_s6 = inlined_call_operand.hbm [shape: f32[8,128], index: 6, kind: output, shape index: {}]  }
   0x1   :  { %12 = vsyncpa [#allocation8], 0 }
   0x2   :  { %13 = vsyncpa [#allocation11], 0 }
   0x3   :  { %14 = vsyncpa [#allocation6], 0  ;;  %s524_s21 = smov [#allocation7]   ;;  %s525_s23 = smov [#allocation4]  }
   0x4   :  { %s31_s22 = sshll.u32 %s524_s21, 4  ;;  %s21_s24 = sshll.u32 %s525_s23, 4  ;;  %s32_s22 = int_to_ptr.vmem [resolvable:$true] %s31_s22  ;;  %s22_s24 = int_to_ptr.vmem [resolvable:$true] %s21_s24 }
   0x5   :  { %s424_s25 = scalar_lea.vmem %s32_s22, 128  ;;  %p429_p1 = scmp.lt.s32.totalorder %s32_s22, %s32_s22 }
   0x6   :  { %p425_p0 = scmp.ne.s32.totalorder %s32_s22, %s424_s25  ;;  %p430_p2 = scmp.lt.s32.totalorder %s424_s25, %s424_s25 }
   0x8   :  { %p431_p3 = por %p430_p2, %p429_p1 }
   0xa   :  { %p432_p4 = pnand %p431_p3, %p425_p0 }
   0xc   :  { %435 = shalt.err (!%p432_p4)
}
   0xd   :  { %34 = dma.hbm_to_vmem [thread:$0]  %s624_s1, 128, %s32_s22, [#allocation8]  }
   0xe   :  { %s444_s28 = scalar_lea.vmem %s22_s24, 128  ;;  %p449_p6 = scmp.lt.s32.totalorder %s22_s24, %s22_s24 }
   0xf   :  { %p445_p5 = scmp.ne.s32.totalorder %s22_s24, %s444_s28  ;;  %p450_p7 = scmp.lt.s32.totalorder %s444_s28, %s444_s28 }
  0x11   :  { %p451_p8 = por %p450_p7, %p449_p6 }
  0x13   :  { %p452_p9 = pnand %p451_p8, %p445_p5 }
  0x15   :  { %455 = shalt.err (!%p452_p9)
}
  0x16   :  { %24 = dma.hbm_to_vmem [thread:$0]  %s623_s0, 128, %s22_s24, [#allocation5]  }
  0x17   :  { %s526_s7 = smov [#allocation9]  }
  0x18   :  { %s40_s8 = sshll.u32 %s526_s7, 4  ;;  %s41_s8 = int_to_ptr.vmem [resolvable:$true] %s40_s8 }
  0x19   :  { %s464_s9 = scalar_lea.vmem %s41_s8, 2048  ;;  %p469_p11 = scmp.lt.s32.totalorder %s41_s8, %s41_s8 }
  0x1a   :  { %p465_p10 = scmp.ne.s32.totalorder %s41_s8, %s464_s9  ;;  %p470_p12 = scmp.lt.s32.totalorder %s464_s9, %s464_s9 }
  0x1c   :  { %p471_p13 = por %p470_p12, %p469_p11 }
  0x1e   :  { %p472_p0 = pnand %p471_p13, %p465_p10 }
  0x20   :  { %475 = shalt.err (!%p472_p0)
}
  0x21   :  { %s527_s1 = smov 128   ;;  %s528_s10 = smov 8  }
  0x22   :  { %46 = dma.hbm_to_vmem [thread:$0]  %s625_s2, 2048, %s41_s8, [#allocation8], %s527_s1, %s527_s1, %s528_s10  }
  0x23   :  { %s529_s13 = smov [#allocation10]  }
  0x24   :  { %s52_s14 = sshll.u32 %s529_s13, 4  ;;  %s53_s14 = int_to_ptr.vmem [resolvable:$true] %s52_s14 }
  0x25   :  { %s484_s0 = scalar_lea.vmem %s53_s14, 2048  ;;  %p489_p2 = scmp.lt.s32.totalorder %s53_s14, %s53_s14 }
  0x26   :  { %p485_p1 = scmp.ne.s32.totalorder %s53_s14, %s484_s0  ;;  %p490_p3 = scmp.lt.s32.totalorder %s484_s0, %s484_s0 }
  0x28   :  { %p491_p4 = por %p490_p3, %p489_p2 }
  0x2a   :  { %p492_p5 = pnand %p491_p4, %p485_p1 }
  0x2c   :  { %495 = shalt.err (!%p492_p5)
}
  0x2d   :  { %58 = dma.hbm_to_vmem [thread:$0]  %s626_s3, 2048, %s53_s14, [#allocation11], %s527_s1, %s527_s1, %s528_s10  }
  0x2e   :  { %516 = dma.done.wait [#allocation5], 128  }
  0x2f   :  { %517 = vsyncadd [#allocation5], 4294967168 }
  0x30   :  { %518 = dma.done.wait [#allocation8], 2176  }
  0x31   :  { %519 = vsyncadd [#allocation8], 4294965120 }
  0x32   :  { %520 = dma.done.wait [#allocation11], 2048  }
  0x33   :  { %521 = vsyncadd [#allocation11], 4294965248  ;;  %v530_v0 = vmov 0.0   ;;  %vm531_vm0 = vmmov 0   ;;  %v98_v1 = vld [vmem:[#allocation9 + $0x78] sm:$0xff]  ;;  %v97_v3 = vld [vmem:[#allocation9 + $0x70] sm:$0xff] }
  0x34   :  { %337 = vmatprep.subr.mxu0 %v530_v0  ;;  %372 = vmatprep.subr.mxu1 %v530_v0  ;;  %v188_v2 = vld [vmem:[#allocation10 + $0x78] sm:$0xff]  ;;  %v187_v4 = vld [vmem:[#allocation10 + $0x70] sm:$0xff]  ;;  %v96_v5 = vld [vmem:[#allocation9 + $0x68] sm:$0xff]  ;;  %s532_s19 = smov [#allocation12]  }
  0x35   :  { %369 = vmatprep.mubr.msk.f32.mxu0 %vm531_vm0, %v530_v0  ;;  %404 = vmatprep.mubr.msk.f32.mxu1 %vm531_vm0, %v530_v0  ;;  %v186_v6 = vld [vmem:[#allocation10 + $0x68] sm:$0xff]  ;;  %v95_v7 = vld [vmem:[#allocation9 + $0x60] sm:$0xff]  ;;  %v94_v9 = vld [vmem:[#allocation9 + $0x58] sm:$0xff]  ;;  %s290_s20 = sshll.u32 %s532_s19, 4  ;;  %s291_s20 = int_to_ptr.vmem [resolvable:$true] %s290_s20 }
  0x36   :  { %338 = vmatpush3.msra.mxu0 %v98_v1  ;;  %373 = vmatpush3.msra.mxu1 %v188_v2  ;;  %v185_v8 = vld [vmem:[#allocation10 + $0x60] sm:$0xff]  ;;  %v184_v10 = vld [vmem:[#allocation10 + $0x58] sm:$0xff]  ;;  %v93_v11 = vld [vmem:[#allocation9 + $0x50] sm:$0xff]  ;;  %s496_s21 = scalar_lea.vmem %s291_s20, 128  ;;  %p501_p7 = scmp.lt.s32.totalorder %s291_s20, %s291_s20 }
  0x37   :  { %339 = vmatprep.subr.mxu0 %v530_v0  ;;  %374 = vmatprep.subr.mxu1 %v530_v0  ;;  %v183_v12 = vld [vmem:[#allocation10 + $0x50] sm:$0xff]  ;;  %v92_v13 = vld [vmem:[#allocation9 + $0x48] sm:$0xff]  ;;  %v91_v15 = vld [vmem:[#allocation9 + $0x40] sm:$0xff]  ;;  %p497_p6 = scmp.ne.s32.totalorder %s291_s20, %s496_s21  ;;  %p502_p8 = scmp.lt.s32.totalorder %s496_s21, %s496_s21 }
  0x38   :  { %340 = vmatpush3.msra.mxu0 %v97_v3  ;;  %375 = vmatpush3.msra.mxu1 %v187_v4  ;;  %v182_v14 = vld [vmem:[#allocation10 + $0x48] sm:$0xff]  ;;  %v181_v16 = vld [vmem:[#allocation10 + $0x40] sm:$0xff]  ;;  %v90_v17 = vld [vmem:[#allocation9 + $0x38] sm:$0xff] }
  0x39   :  { %341 = vmatprep.subr.mxu0 %v530_v0  ;;  %376 = vmatprep.subr.mxu1 %v530_v0  ;;  %v180_v18 = vld [vmem:[#allocation10 + $0x38] sm:$0xff]  ;;  %v89_v19 = vld [vmem:[#allocation9 + $0x30] sm:$0xff]  ;;  %v88_v21 = vld [vmem:[#allocation9 + $0x28] sm:$0xff]  ;;  %p503_p9 = por %p502_p8, %p501_p7 }
  0x3a   :  { %342 = vmatpush3.msra.mxu0 %v96_v5  ;;  %377 = vmatpush3.msra.mxu1 %v186_v6  ;;  %v179_v20 = vld [vmem:[#allocation10 + $0x30] sm:$0xff]  ;;  %v178_v22 = vld [vmem:[#allocation10 + $0x28] sm:$0xff]  ;;  %v87_v23 = vld [vmem:[#allocation9 + $0x20] sm:$0xff] }
  0x3b   :  { %343 = vmatprep.subr.mxu0 %v530_v0  ;;  %378 = vmatprep.subr.mxu1 %v530_v0  ;;  %v177_v24 = vld [vmem:[#allocation10 + $0x20] sm:$0xff]  ;;  %v86_v25 = vld [vmem:[#allocation9 + $0x18] sm:$0xff]  ;;  %v85_v27 = vld [vmem:[#allocation9 + $0x10] sm:$0xff]  ;;  %p504_p10 = pnand %p503_p9, %p497_p6 }
  0x3c   :  { %344 = vmatpush3.msra.mxu0 %v95_v7  ;;  %379 = vmatpush3.msra.mxu1 %v185_v8  ;;  %v176_v26 = vld [vmem:[#allocation10 + $0x18] sm:$0xff]  ;;  %v175_v28 = vld [vmem:[#allocation10 + $0x10] sm:$0xff]  ;;  %v84_v29 = vld [vmem:[#allocation9 + $0x8] sm:$0xff] }
  0x3d   :  { %345 = vmatprep.subr.mxu0 %v530_v0  ;;  %380 = vmatprep.subr.mxu1 %v530_v0  ;;  %v174_v30 = vld [vmem:[#allocation10 + $0x8] sm:$0xff]  ;;  %v83_v31 = vld [vmem:[#allocation9] sm:$0xff]  ;;  %v82_v33 = vld [vmem:[#allocation4] sm:$0xff] }
  0x3e   :  { %346 = vmatpush3.msra.mxu0 %v94_v9  ;;  %381 = vmatpush3.msra.mxu1 %v184_v10  ;;  %v173_v32 = vld [vmem:[#allocation10] sm:$0xff]  ;;  %v172_v34 = vld [vmem:[#allocation7] sm:$0xff]  ;;  %v301_v35 = vld [vmem:[%s627_s4] ss:$0 sm:$0xff] }
  0x3f   :  { %347 = vmatprep.subr.mxu0 %v530_v0  ;;  %382 = vmatprep.subr.mxu1 %v530_v0  ;;  %v302_v41 = vld [vmem:[%s628_s5] ss:$0 sm:$0xff] }
  0x40   :  { %348 = vmatpush3.msra.mxu0 %v93_v11  ;;  %383 = vmatpush3.msra.mxu1 %v183_v12 }
  0x41   :  { %349 = vmatprep.subr.mxu0 %v530_v0  ;;  %384 = vmatprep.subr.mxu1 %v530_v0 }
  0x42   :  { %350 = vmatpush3.msra.mxu0 %v92_v13  ;;  %385 = vmatpush3.msra.mxu1 %v182_v14 }
  0x43   :  { %351 = vmatprep.subr.mxu0 %v530_v0  ;;  %386 = vmatprep.subr.mxu1 %v530_v0 }
  0x44   :  { %352 = vmatpush3.msra.mxu0 %v91_v15  ;;  %387 = vmatpush3.msra.mxu1 %v181_v16 }
  0x45   :  { %353 = vmatprep.subr.mxu0 %v530_v0  ;;  %388 = vmatprep.subr.mxu1 %v530_v0 }
  0x46   :  { %354 = vmatpush3.msra.mxu0 %v90_v17  ;;  %389 = vmatpush3.msra.mxu1 %v180_v18 }
  0x47   :  { %355 = vmatprep.subr.mxu0 %v530_v0  ;;  %390 = vmatprep.subr.mxu1 %v530_v0 }
  0x48   :  { %356 = vmatpush3.msra.mxu0 %v89_v19  ;;  %391 = vmatpush3.msra.mxu1 %v179_v20 }
  0x49   :  { %357 = vmatprep.subr.mxu0 %v530_v0  ;;  %392 = vmatprep.subr.mxu1 %v530_v0 }
  0x4a   :  { %358 = vmatpush3.msra.mxu0 %v88_v21  ;;  %393 = vmatpush3.msra.mxu1 %v178_v22 }
  0x4b   :  { %359 = vmatprep.subr.mxu0 %v530_v0  ;;  %394 = vmatprep.subr.mxu1 %v530_v0 }
  0x4c   :  { %360 = vmatpush3.msra.mxu0 %v87_v23  ;;  %395 = vmatpush3.msra.mxu1 %v177_v24 }
  0x4d   :  { %361 = vmatprep.subr.mxu0 %v530_v0  ;;  %396 = vmatprep.subr.mxu1 %v530_v0 }
  0x4e   :  { %362 = vmatpush3.msra.mxu0 %v86_v25  ;;  %397 = vmatpush3.msra.mxu1 %v176_v26 }
  0x4f   :  { %363 = vmatprep.subr.mxu0 %v530_v0  ;;  %398 = vmatprep.subr.mxu1 %v530_v0 }
  0x50   :  { %364 = vmatpush3.msra.mxu0 %v85_v27  ;;  %399 = vmatpush3.msra.mxu1 %v175_v28 }
  0x51   :  { %365 = vmatprep.subr.mxu0 %v530_v0  ;;  %400 = vmatprep.subr.mxu1 %v530_v0 }
  0x52   :  { %366 = vmatpush3.msra.mxu0 %v84_v29  ;;  %401 = vmatpush3.msra.mxu1 %v174_v30 }
  0x53   :  { %367 = vmatprep.subr.mxu0 %v530_v0  ;;  %402 = vmatprep.subr.mxu1 %v530_v0 }
  0x54   :  { %368 = vmatpush3.msra.mxu0 %v83_v31  ;;  %403 = vmatpush3.msra.mxu1 %v173_v32 }
  0x55   :  { %370 = vmatmul.mubr.f32.vlgmr.msra.gmra.mxu0 %v82_v33  ;;  %405 = vmatmul.mubr.f32.vlgmr.msra.gmra.mxu1 %v172_v34 }
 0x115   :  { %v165_v36 = vpop.f32.mrf.mxu0  ;;  %v255_v37 = vpop.f32.mrf.mxu1 }
 0x116   :  { %v273_v38 = vmul.f32 %v301_v35, %v255_v37 }
 0x117   :  { %v371_v39 = vpop.f32.mrf.mxu0  ;;  %v406_v40 = vpop.f32.mrf.mxu1 }
 0x118   :  { %v274_v42 = vadd.f32 %v273_v38, %v165_v36 }
 0x11a   :  { %v282_v43 = vadd.f32 %v302_v41, %v274_v42 }
 0x11c   :  { %283 = vst [vmem:[#allocation12] sm:$0xff] %v282_v43 }
 0x11d   :  { %507 = shalt.err (!%p504_p10)
}
 0x11e   :  { %293 = dma.vmem_to_hbm [thread:$0]  %s291_s20, 128, %s629_s6, [#allocation6]  }
 0x11f   :  { %522 = dma.done.wait [#allocation6], 128  }
 0x120   :  { %523 = vsyncadd [#allocation6], 4294967168 }
 0x121   :  { %297 = vsyncpa [#allocation5], 1 }
 0x122   :  { %298 = vsyncpa [#allocation8], 1 }
 0x123   :  { %299 = vsyncpa [#allocation11], 1 }
 0x124   :  { %300 = vsyncpa [#allocation6], 1 }

</bundles_post_ra>
